<compile_context>
chip_gen: v5e
topology: v5e:2x2
jax: 0.10.0
libtpu: 0.0.40
codegen_flags: <defaults>
</compile_context>

<pallas_src>
import itertools
import math

import jax
import jax.numpy as jnp
from jax.experimental import pallas as pl
from jax.experimental.pallas import tpu as pltpu


_MIN_GRID_STEPS = 4            # keep >= this many grid steps (v7x megacore + pipelining)
_MAX_FOLD_UNROLL = 8           # static in-kernel unroll cap over folded leading axes
_COPY_UNROLL_CAP = 8           # static unroll cap for the blocked pure-copy path
_MIN_TILE_BYTES = 512 * 1024   # don't shrink tiles below this just to enlarge the grid

_CHIP_CONFIG = None


def _chip_config():
    """(tile_budget_bytes, vmem_limit_bytes, lane_cap) derived from the TPU generation."""
    global _CHIP_CONFIG
    if _CHIP_CONFIG is not None:
        return _CHIP_CONFIG
    kind = ""
    try:
        kind = jax.devices()[0].device_kind.lower()
    except Exception:
        pass
    vmem_phys = None
    try:
        vmem_phys = int(pltpu.get_tpu_info().vmem_capacity_bytes)
    except Exception:
        vmem_phys = None
    is_v7 = ("v7" in kind) or ("7x" in kind) or (
        vmem_phys is not None and vmem_phys <= 80 * 2**20)
    if is_v7:
        # 64 MiB physical VMEM / 3.2 TB/s per TC: big per-step payloads, but leave
        # compiler-scratch headroom under the 64 MiB ceiling.
        cfg = (4 * 2**20, 48 * 2**20, 1024)
    else:
        # v5e / v6e: 128 MiB physical VMEM; ~512-wide few-MiB tiles already sit at
        # ~85% of the HBM roofline on v6e, so don't spend more VMEM than that.
        cfg = (4 * 2**20, 64 * 2**20, 512)
    _CHIP_CONFIG = cfg
    return cfg


def _pick_block(dim, unit, cap):
    """Block size for one of the trailing dims.

    Returns the full dim when it fits under `cap` (a legal block), otherwise the
    largest multiple of `unit` <= cap, preferring an exact divisor (no ragged
    boundary block) when one exists at >= half that size.  Ragged boundary blocks
    are handled by Pallas masking (cdiv grid), so tiles stay bounded even for large
    non-128-divisible dims.
    """
    cap = max(unit, min(cap, dim))
    if dim <= cap:
        return dim
    m = cap - cap % unit
    k = m
    while k >= max(unit, m // 2):
        if dim % k == 0:
            return k
        k -= unit
    return m


def _pallas_swap(x, lo, hi):
    """Single-pass Pallas transpose for the two relayout-free cases:
       (a) lo,hi are the trailing two axes, (b) both lie outside the trailing pair."""
    ndim, shape = x.ndim, x.shape
    itemsize = jnp.dtype(x.dtype).itemsize
    tile_budget, vmem_limit, lane_cap = _chip_config()
    elem_budget = max(1, tile_budget // itemsize)
    sub_unit = max(8, 32 // itemsize)          # f32: 8, bf16: 16, int8/fp8: 32
    sec, last = ndim - 2, ndim - 1
    swap_in_tile = (lo, hi) == (sec, last)

    # ---- block sizes for the trailing two dims (always materialized in the tile)
    if swap_in_tile:
        # Both trailing dims serve as a lane axis (input lane / output lane): grow
        # the OUTPUT lane (= input `sec`) first and keep both 128-aligned (or full).
        blk_sec = _pick_block(shape[sec], 128, lane_cap)
        blk_last = _pick_block(shape[last], 128,
                               min(lane_cap, max(128, elem_budget // blk_sec)))
    else:
        # Lane/sublane layout untouched: ordinary (sublane, lane) tile.
        blk_last = _pick_block(shape[last], 128, lane_cap)
        blk_sec = _pick_block(shape[sec], sub_unit,
                              min(lane_cap, max(sub_unit, elem_budget // blk_last)))
    blocks = {sec: blk_sec, last: blk_last}
    tile_elems = blk_sec * blk_last

    folded = set()
    if swap_in_tile:
        material = {sec, last}
        # Fold small leading axes fully into the block so each grid step moves a big
        # slab, subject to: tile budget, short static unroll (vreg pressure), and the
        # grid never collapsing below _MIN_GRID_STEPS (v7x megacore + pipelining).
        base_grid = pl.cdiv(shape[sec], blk_sec) * pl.cdiv(shape[last], blk_last)
        unroll = 1
        for a in range(ndim - 3, -1, -1):          # innermost leading axis first
            d = shape[a]
            rem_lead = 1
            for b in range(ndim - 2):
                if b != a and b not in folded:
                    rem_lead *= shape[b]
            ok = (tile_elems * d * itemsize <= tile_budget
                  and unroll * d <= _MAX_FOLD_UNROLL
                  and base_grid * rem_lead >= _MIN_GRID_STEPS)
            if ok:
                folded.add(a)
                tile_elems *= d
                unroll *= d
    else:
        material = {lo, hi, sec, last}
        # Block the two swapped leading axes so each grid step still moves a
        # multi-MiB slab even when the trailing slab is small (otherwise the
        # ~0.35us per-grid-step overhead dominates by orders of magnitude).
        rem = max(1, elem_budget // tile_elems)
        blk_hi = min(shape[hi], rem)
        blk_lo = min(shape[lo], max(1, rem // blk_hi))
        if blk_hi > _COPY_UNROLL_CAP:
            blk_lo = min(blk_lo, _COPY_UNROLL_CAP)  # in-kernel loop runs min(lo,hi) times
        rest = 1
        for a in range(ndim - 2):
            if a not in (lo, hi):
                rest *= shape[a]

        def _grid_prod(bl, bh):
            return (rest * pl.cdiv(shape[lo], bl) * pl.cdiv(shape[hi], bh)
                    * pl.cdiv(shape[sec], blk_sec) * pl.cdiv(shape[last], blk_last))

        # Keep enough grid steps for both TensorCores / pipelining, unless the tiles
        # are already small anyway.
        while (_grid_prod(blk_lo, blk_hi) < _MIN_GRID_STEPS
               and blk_lo * blk_hi > 1
               and tile_elems * blk_lo * blk_hi * itemsize > _MIN_TILE_BYTES):
            if blk_hi >= blk_lo:
                blk_hi = (blk_hi + 1) // 2
            else:
                blk_lo = (blk_lo + 1) // 2
        blocks[lo], blocks[hi] = blk_lo, blk_hi

    def sigma(p):                      # output axis p draws from input axis sigma(p)
        return hi if p == lo else (lo if p == hi else p)

    # ---- grid: one axis per non-folded input dim; every axis is "parallel"
    #      (each output block is written exactly once).
    grid_axes = [a for a in range(ndim) if a not in folded]
    gpos = {a: i for i, a in enumerate(grid_axes)}
    grid = tuple(pl.cdiv(shape[a], blocks[a]) if a in material else shape[a]
                 for a in grid_axes)

    def block_entry(a):
        if a in folded:
            return shape[a]            # full extent, folded into the tile
        if a in material:
            return blocks[a]
        return pl.Squeezed()           # leading axis handled purely by the grid

    in_block = tuple(block_entry(a) for a in range(ndim))
    out_block = tuple(block_entry(sigma(p)) for p in range(ndim))

    def in_index_map(*g):
        return tuple(0 if a in folded else g[gpos[a]] for a in range(ndim))

    def out_index_map(*g):             # the axis swap lives here (block granularity)
        return tuple(0 if sigma(p) in folded else g[gpos[sigma(p)]]
                     for p in range(ndim))

    # ---- kernel body
    if swap_in_tile:
        lead_dims = tuple(shape[a] for a in sorted(folded))
        if not lead_dims:
            def kernel(x_ref, o_ref):
                o_ref[...] = jnp.swapaxes(x_ref[...], -1, -2)
        else:
            lead_index = tuple(itertools.product(*(range(d) for d in lead_dims)))

            def kernel(x_ref, o_ref):
                # Short static loop (<= _MAX_FOLD_UNROLL) over folded leading axes;
                # each slice is a plain, well-supported 2-D minor transpose.
                for idx in lead_index:
                    sl = idx + (slice(None), slice(None))
                    o_ref[sl] = jnp.swapaxes(x_ref[sl], -1, -2)
        # TODO(synk): on v7x, check the bundle for XLU/vst-slot saturation and, if
        # needed, add pipeline_mode=pl.Buffered(3) on the input spec.
    else:
        # Lane/sublane layout untouched; in-tile movement along the two (blocked)
        # leading swap axes is a short static loop of slab copies (vreg copies only).
        # Kernel tile view axes (squeezed dims removed): (lo, hi, sec, last).
        blk_lo, blk_hi = blocks[lo], blocks[hi]
        if blk_lo == 1 and blk_hi == 1:
            def kernel(x_ref, o_ref):
                o_ref[...] = x_ref[...]
        elif blk_lo <= blk_hi:
            def kernel(x_ref, o_ref):
                for i in range(blk_lo):
                    o_ref[:, i] = x_ref[i]
        else:
            def kernel(x_ref, o_ref):
                for i in range(blk_hi):
                    o_ref[i] = x_ref[:, i]

    out_shape = list(shape)
    out_shape[lo], out_shape[hi] = out_shape[hi], out_shape[lo]

    return pl.pallas_call(
        kernel,
        out_shape=jax.ShapeDtypeStruct(tuple(out_shape), x.dtype),
        grid=grid,
        in_specs=[pl.BlockSpec(in_block, in_index_map)],
        out_specs=pl.BlockSpec(out_block, out_index_map),
        compiler_params=pltpu.CompilerParams(
            dimension_semantics=("parallel",) * len(grid),
            vmem_limit_bytes=vmem_limit,
        ),
        cost_estimate=pl.CostEstimate(
            flops=0, transcendentals=0,
            bytes_accessed=2 * math.prod(shape) * itemsize),
    )(x)


def pallas_transpose(x, dim0, dim1):
    """Equivalent of torch.Tensor.transpose(dim0, dim1)."""
    ndim = x.ndim
    if ndim <= 1:
        return x
    d0, d1 = dim0 % ndim, dim1 % ndim
    if d0 == d1:
        return x
    lo, hi = sorted((d0, d1))
    sec, last = ndim - 2, ndim - 1
    if (lo, hi) == (sec, last):
        if x.shape[sec] < 128:
            # Narrow OUTPUT lane dim -> every store would be a masked vst.msk partial
            # store (~4.5x penalty); a single XLA transpose pass is cheaper here.
            # TODO(synk): stage through a lane-dense VMEM scratch (fold leading dims
            # into the lane axis) instead of falling back.
            return jnp.swapaxes(x, lo, hi)
        # TODO(synk): on v5e, packed sub-32-bit minor swaps can saturate the single
        # vst slot (repack-heavy); verify in the bundle and prefer the XLA fallback
        # there if so.
        return _pallas_swap(x, lo, hi)          # hot path: trailing-pair swap
    if hi <= ndim - 3:
        return _pallas_swap(x, lo, hi)          # both axes outside the trailing pair
    # TODO(synk): leading<->(lane/sublane) swaps need an in-kernel sublane<->major
    # relayout (or sublane-strided stores) that Mosaic does not reliably lower; use a
    # single XLA transpose pass (1 HBM read + 1 write).
    return jnp.swapaxes(x, lo, hi)


class Transpose:
    """Drop-in forward for nnet/layers.py::Transpose."""

    def __init__(self, dim0, dim1):
        self.dim0, self.dim1 = dim0, dim1

    def __call__(self, x):
        return pallas_transpose(x, self.dim0, self.dim1)


if __name__ == "__main__":
    key = jax.random.PRNGKey(0)
    k0, k1, k2, k3, k4 = jax.random.split(key, 5)

    # Hot path: trailing-pair swap with a lane-dense output (folds batch, grid=4).
    x = jax.random.normal(k0, (2, 4, 128, 128), dtype=jnp.float32)
    mod = Transpose(2, 3)
    y = jax.block_until_ready(mod(x))
    ref = jnp.swapaxes(x, 2, 3)
    assert y.shape == ref.shape and y.dtype == ref.dtype
    assert bool(jnp.array_equal(y, ref))

    # Negative dims, torch semantics (same kernel path).
    ym = jax.block_until_ready(pallas_transpose(x, -1, -2))
    assert bool(jnp.array_equal(ym, jnp.swapaxes(x, -1, -2)))

    # Leading-axes swap: blocked lo/hi, permutation carried by the out index_map,
    # in-tile slab copies only.
    y01 = jax.block_until_ready(pallas_transpose(x, 0, 1))
    assert bool(jnp.array_equal(y01, jnp.swapaxes(x, 0, 1)))

    # Leading<->lane pair goes through the single-pass XLA fallback (see TODO).
    y13 = jax.block_until_ready(pallas_transpose(x, 1, 3))
    assert bool(jnp.array_equal(y13, jnp.swapaxes(x, 1, 3)))

    # Narrow output lane (<128): routed to the XLA fallback to avoid masked stores.
    xn = jax.random.normal(k1, (2, 4, 16, 128), dtype=jnp.float32)
    yn = jax.block_until_ready(Transpose(2, 3)(xn))
    assert bool(jnp.array_equal(yn, jnp.swapaxes(xn, 2, 3)))

    # bf16 3-D minor swap: fold is skipped so the grid keeps 2 parallel steps.
    xb = jax.random.normal(k2, (2, 256, 512), dtype=jnp.bfloat16)
    yb = jax.block_until_ready(pallas_transpose(xb, 1, 2))
    assert bool(jnp.array_equal(yb, jnp.swapaxes(xb, 1, 2)))

    # Ragged last dim (1300 not a multiple of the 512/1024 block): cdiv grid + masked
    # boundary block.
    xr = jax.random.normal(k3, (256, 1300), dtype=jnp.float32)
    yr = jax.block_until_ready(pallas_transpose(xr, 0, 1))
    assert bool(jnp.array_equal(yr, jnp.swapaxes(xr, 0, 1)))

    # Leading-axes swap with a small trailing slab and an untouched middle axis:
    # exercises the blocked copy path (slab-copy loop over the smaller swap axis).
    xs = jax.random.normal(k4, (4, 3, 2, 8, 128), dtype=jnp.float32)
    ys = jax.block_until_ready(pallas_transpose(xs, 0, 2))
    assert bool(jnp.array_equal(ys, jnp.swapaxes(xs, 0, 2)))

    print("KERNEL_OK")
</pallas_src>

<mosaic_0001>
module attributes {stable_mosaic.version = 11 : i64} {
  func.func @kernel(%arg0: i32, %arg1: i32, %arg2: i32, %arg3: memref<2x1x128x128xf32, #tpu.memory_space<vmem>>, %arg4: memref<2x1x128x128xf32, #tpu.memory_space<vmem>>) attributes {dimension_semantics = [#tpu.dimension_semantics<parallel>, #tpu.dimension_semantics<parallel>, #tpu.dimension_semantics<parallel>], iteration_bounds = array<i64: 4, 1, 1>, scalar_prefetch = 0 : i64, scratch_operands = 0 : i64, tpu.core_type = #tpu.core_type<tc>, window_params = [{transform_indices = @transform_0, window_bounds = array<i64: 2, 1, 128, 128>}, {transform_indices = @transform_1, window_bounds = array<i64: 2, 1, 128, 128>}]} {
    %c0 = arith.constant 0 : index
    %c0_0 = arith.constant 0 : index
    %c0_1 = arith.constant 0 : index
    %c0_2 = arith.constant 0 : index
    %0 = vector.load %arg3[%c0, %c0_0, %c0_1, %c0_2] : memref<2x1x128x128xf32, #tpu.memory_space<vmem>>, vector<1x1x128x128xf32>
    %1 = vector.shape_cast %0 : vector<1x1x128x128xf32> to vector<128x128xf32>
    %2 = tpu.transpose %1, [1, 0] : vector<128x128xf32> -> vector<128x128xf32>
    %c0_3 = arith.constant 0 : index
    %c0_4 = arith.constant 0 : index
    %c0_5 = arith.constant 0 : index
    %c0_6 = arith.constant 0 : index
    %3 = vector.load %arg4[%c0_3, %c0_4, %c0_5, %c0_6] : memref<2x1x128x128xf32, #tpu.memory_space<vmem>>, vector<1x1x128x128xf32>
    %4 = vector.shape_cast %3 : vector<1x1x128x128xf32> to vector<128x128xf32>
    %5 = vector.shape_cast %2 : vector<128x128xf32> to vector<1x1x128x128xf32>
    tpu.vector_store %arg4[%c0_3, %c0_4, %c0_5, %c0_6], %5 {strides = array<i32>} : memref<2x1x128x128xf32, #tpu.memory_space<vmem>>, vector<1x1x128x128xf32>,
    %c1 = arith.constant 1 : index
    %c0_7 = arith.constant 0 : index
    %c0_8 = arith.constant 0 : index
    %c0_9 = arith.constant 0 : index
    %6 = vector.load %arg3[%c1, %c0_7, %c0_8, %c0_9] : memref<2x1x128x128xf32, #tpu.memory_space<vmem>>, vector<1x1x128x128xf32>
    %7 = vector.shape_cast %6 : vector<1x1x128x128xf32> to vector<128x128xf32>
    %8 = tpu.transpose %7, [1, 0] : vector<128x128xf32> -> vector<128x128xf32>
    %c1_10 = arith.constant 1 : index
    %c0_11 = arith.constant 0 : index
    %c0_12 = arith.constant 0 : index
    %c0_13 = arith.constant 0 : index
    %9 = vector.load %arg4[%c1_10, %c0_11, %c0_12, %c0_13] : memref<2x1x128x128xf32, #tpu.memory_space<vmem>>, vector<1x1x128x128xf32>
    %10 = vector.shape_cast %9 : vector<1x1x128x128xf32> to vector<128x128xf32>
    %11 = vector.shape_cast %8 : vector<128x128xf32> to vector<1x1x128x128xf32>
    tpu.vector_store %arg4[%c1_10, %c0_11, %c0_12, %c0_13], %11 {strides = array<i32>} : memref<2x1x128x128xf32, #tpu.memory_space<vmem>>, vector<1x1x128x128xf32>,
    return
  }
  func.func @transform_0(%arg0: i32, %arg1: i32, %arg2: i32) -> (i32, i32, i32, i32) {
    %c0_i32 = arith.constant 0 : i32
    %c0_i32_0 = arith.constant 0 : i32
    return %c0_i32, %arg0, %arg1, %arg2 : i32, i32, i32, i32
  }
  func.func @transform_1(%arg0: i32, %arg1: i32, %arg2: i32) -> (i32, i32, i32, i32) {
    %c0_i32 = arith.constant 0 : i32
    %c0_i32_0 = arith.constant 0 : i32
    return %c0_i32, %arg0, %arg2, %arg1 : i32, i32, i32, i32
  }
}

</mosaic_0001>

<bundles_post_ra>
// kernel: tpu_custom_call.1
= control target key start
LH: loop header
LB: loop body
LE: loop exit
PB: predicated region body
PF: predicated region fallthrough
CT: control target
= control target key end

     0   :  { %6 = vsyncpa [#allocation3], 0  ;;  %s880_s0 = inlined_call_operand.hbm [shape: f32[2,4,128,128], index: 0, kind: input, shape index: {}]   ;;  %s881_s1 = inlined_call_operand.hbm [shape: f32[2,4,128,128], index: 1, kind: output, shape index: {}]  }
   0x1   :  { %8 = vsyncpa [#allocation3 + $0x1], 0 }
   0x2   :  { %9 = vsyncpa [#allocation4], 0 }
   0x3   :  { %11 = vsyncpa [#allocation4 + $0x1], 0  ;;  %s671_s6 = smov 0   ;;  %s673_s7 = smov 0  }
   0x4   :  { %s675_s8 = smov 0   ;;  %s677_s9 = smov 0  }
   0x5   :  { %s679_s10 = smov 0   ;;  %s681_s11 = smov 0  }
   0x6 LB: > { %s458_s12 = sadd.s32 4294967295, %s646_s11   ;;  %s459_s13 = sadd.s32 4294967294, %s646_s11   ;;  %s646_s11 = sphi %s681_s11, %s17_s11   ;;  %s642_s10 = sphi %s679_s10, %s890_s10   ;;  %s638_s9 = sphi %s677_s9, %s889_s9   ;;  %s634_s8 = sphi %s675_s8, %s888_s8   ;;  %s630_s7 = sphi %s673_s7, %s887_s7   ;;  %s626_s6 = sphi %s671_s6, %s886_s6  }
   0x7   : > { %s36_s14 = sadd.s32 1, %s642_s10  ;;  %s47_s15 = sadd.s32 1, %s634_s8 }
   0x8   : > { %p38_p0 = scmp.ge.s32.totalorder %s36_s14, 4  ;;  %p54_p1 = scmp.ne.s32.totalorder %s634_s8, %s630_s7 }
   0x9   : > { %p55_p2 = scmp.eq.s32.totalorder %s646_s11, 0  ;;  %p60_p3 = scmp.ne.s32.totalorder %s630_s7, %s626_s6 }
   0xa   : > { %s892_s14 = smov (%p38_p0, %s36_s14), 0  ;;  %p61_p5 = scmp.eq.s32.totalorder %s458_s12, 0 }
   0xb   : > { %p712_p4 = por %p55_p2, %p54_p1  ;;  %s40_s17 = ssub.s32 %s642_s10, %s892_s14 }
   0xc   : > { %p88_p6 = scmp.eq.s32.totalorder %s458_s12, 3  ;;  %p45_p7 = scmp.eq.s32.totalorder %s40_s17, 0 }
   0xd   : > { %p718_p8 = por %p61_p5, %p60_p3  ;;  %p94_p10 = scmp.eq.s32.totalorder %s459_s13, 3 }
   0xe   : > { %p722_p9 = por %p88_p6, %p54_p1  ;;  %p461_p12 = scmp.ge.s32.totalorder %s646_s11, 4 }
   0xf   : > { %s727_s20 = scalar_select %p45_p7, %s634_s8, %s47_s15  }
  0x10   : > { %p729_p11 = por %p94_p10, %p60_p3  ;;  %110 = sbr.rel (%p461_p12) target bundleno = 35 (0x23), region = 16 }
  0x15   : > { %s114_s22 = sand.u32 1, %s634_s8   ;;  %s507_s23 = sshll.u32 %s642_s10, 7 }
  0x16   : > { %s462_s24 = sshll.u32 %s114_s22, 8  ;;  %s126_s27 = scalar_lea.hbm %s880_s0, %s507_s23 }
  0x17   : > { %s509_s28 = scalar_select %p712_p4, [#allocation0], [#allocation10] }
  0x18   : > { %s139_s29 = sshll.u32 %s126_s27, 4  ;;  %s118_s30 = scalar_lea.vmem [#allocation2], %s462_s24  ;;  %s140_s29 = int_to_ptr.hbm [resolvable:$true] %s139_s29 }
  0x19   : > { %s141_s2 = sshll.u32 %s118_s30, 4  ;;  %s131_s3 = sld [smem:[%s509_s28]]   ;;  %s142_s2 = int_to_ptr.vmem [resolvable:$true] %s141_s2 }
  0x1a   : > { %s648_s4 = smov 8192   ;;  %s649_s5 = smov 2048  }
  0x1b   : > { %510 = sst [smem:[#allocation7]] (%p712_p4), %s648_s4  ;;  %s650_s12 = smov 16  }
  0x1c   : > { %511 = sst [smem:[#allocation7 + $0x1]] (%p712_p4), %s649_s5  ;;  %s651_s13 = smov 128  }
  0x1d   : > { %512 = sst [smem:[#allocation7 + $0x2]] (%p712_p4), %s650_s12  ;;  %s652_s23 = smov 8  }
  0x1e   : > { %513 = sst [smem:[#allocation7 + $0x3]] (%p712_p4), %s651_s13  ;;  %s115_s24 = scalar_lea.sflag [#allocation3], %s114_s22 }
  0x1f   : > { %s465_s15 = sshll.u32 %s131_s3, 26  ;;  %514 = sst [smem:[#allocation7 + $0x4]] (%p712_p4), %s651_s13 }
  0x20   : > { %s466_s17 = sadd.s32 134217728, %s465_s15  ;;  %515 = sst [smem:[#allocation7 + $0x5]] (%p712_p4), %s652_s23 }
  0x21   : > { %s653_s25 = smov [#allocation6]  }
  0x22   : > { %516 = dma.general (%p712_p4), %s140_s29, 4096, %s142_s2, %s115_s24, %s653_s25, [#allocation7], %s466_s17, 0  }
  0x23 PF: > { %p467_p13 = scmp.ge.s32.totalorder %s646_s11, 1  ;;  %p162_p0 = scmp.lt.s32.totalorder %s646_s11, 5 }
  0x25   : > { %p163_p1 = pnand %p467_p13, %p162_p0 }
  0x26   : > { %s758_s26 = sand.u32 (!%p163_p1), 1, %s630_s7  }
  0x27   : > { %166 = sbr.rel (%p163_p1) target bundleno = 343 (0x157), region = 24  ;;  %s468_s27 = sshll.u32 (!%p163_p1), %s758_s26, 8 }
  0x28   : > { %s169_s28 = scalar_lea.sflag (!%p163_p1), [#allocation3], %s758_s26  ;;  %s764_s22 = scalar_lea.vmem (!%p163_p1), [#allocation2], %s468_s27 }
  0x2c   : > { %617 = dma.done.wait (%p718_p8), %s169_s28, 4096  }
  0x2d   : > { %619 = vsyncadd (%p718_p8), %s169_s28, 4294963200  ;;  %v470_v0 = vld [vmem:[%s764_s22 + $0x80] sm:$0xff]  ;;  %v471_v2 = vld [vmem:[%s764_s22 + $0x88] sm:$0xff]  ;;  %s804_s16 = scalar_lea.vmem [#allocation5], %s468_s27  ;;  %s325_s18 = scalar_lea.sflag [#allocation4], %s758_s26 }
  0x2e   : > { %v194_v1 = vld [vmem:[%s764_s22] sm:$0xff]  ;;  %275 = vxpose.xlu1.b32.start [1/16] %v470_v0, 128  ;;  %v195_v3 = vld [vmem:[%s764_s22 + $0x8] sm:$0xff]  ;;  %v472_v4 = vld [vmem:[%s764_s22 + $0x90] sm:$0xff] }
  0x2f   : > { %210 = vxpose.xlu0.b32.start [1/16] %v194_v1, 128  ;;  %v196_v5 = vld [vmem:[%s764_s22 + $0x10] sm:$0xff]  ;;  %v473_v6 = vld [vmem:[%s764_s22 + $0x98] sm:$0xff]  ;;  %v474_v8 = vld [vmem:[%s764_s22 + $0xa0] sm:$0xff] }
  0x30   : > { %v197_v7 = vld [vmem:[%s764_s22 + $0x18] sm:$0xff]  ;;  %v198_v9 = vld [vmem:[%s764_s22 + $0x20] sm:$0xff]  ;;  %v475_v10 = vld [vmem:[%s764_s22 + $0xa8] sm:$0xff] }
  0x31   : > { %v199_v11 = vld [vmem:[%s764_s22 + $0x28] sm:$0xff]  ;;  %v476_v12 = vld [vmem:[%s764_s22 + $0xb0] sm:$0xff]  ;;  %v477_v14 = vld [vmem:[%s764_s22 + $0xb8] sm:$0xff] }
  0x32   : > { %v200_v13 = vld [vmem:[%s764_s22 + $0x30] sm:$0xff]  ;;  %v201_v15 = vld [vmem:[%s764_s22 + $0x38] sm:$0xff]  ;;  %v478_v16 = vld [vmem:[%s764_s22 + $0xc0] sm:$0xff] }
  0x33   : > { %v202_v17 = vld [vmem:[%s764_s22 + $0x40] sm:$0xff]  ;;  %v479_v18 = vld [vmem:[%s764_s22 + $0xc8] sm:$0xff]  ;;  %v480_v20 = vld [vmem:[%s764_s22 + $0xd0] sm:$0xff] }
  0x34   : > { %v203_v19 = vld [vmem:[%s764_s22 + $0x48] sm:$0xff]  ;;  %v204_v21 = vld [vmem:[%s764_s22 + $0x50] sm:$0xff]  ;;  %v481_v22 = vld [vmem:[%s764_s22 + $0xd8] sm:$0xff] }
  0x35   : > { %v205_v23 = vld [vmem:[%s764_s22 + $0x58] sm:$0xff]  ;;  %v482_v24 = vld [vmem:[%s764_s22 + $0xe0] sm:$0xff]  ;;  %v483_v26 = vld [vmem:[%s764_s22 + $0xe8] sm:$0xff] }
  0x36   : > { %276 = vxpose.xlu1.b32.cont [2/16] %v471_v2, 128  ;;  %v206_v25 = vld [vmem:[%s764_s22 + $0x60] sm:$0xff]  ;;  %v207_v27 = vld [vmem:[%s764_s22 + $0x68] sm:$0xff]  ;;  %v484_v28 = vld [vmem:[%s764_s22 + $0xf0] sm:$0xff] }
  0x37   : > { %211 = vxpose.xlu0.b32.cont [2/16] %v195_v3, 128  ;;  %v208_v29 = vld [vmem:[%s764_s22 + $0x70] sm:$0xff]  ;;  %v485_v30 = vld [vmem:[%s764_s22 + $0xf8] sm:$0xff] }
  0x38   : > { %v209_v31 = vld [vmem:[%s764_s22 + $0x78] sm:$0xff] }
  0x3e   : > { %277 = vxpose.xlu1.b32.cont [3/16] %v472_v4, 128 }
  0x3f   : > { %212 = vxpose.xlu0.b32.cont [3/16] %v196_v5, 128 }
  0x46   : > { %278 = vxpose.xlu1.b32.cont [4/16] %v473_v6, 128 }
  0x47   : > { %213 = vxpose.xlu0.b32.cont [4/16] %v197_v7, 128 }
  0x4e   : > { %279 = vxpose.xlu1.b32.cont [5/16] %v474_v8, 128 }
  0x4f   : > { %214 = vxpose.xlu0.b32.cont [5/16] %v198_v9, 128 }
  0x56   : > { %280 = vxpose.xlu1.b32.cont [6/16] %v475_v10, 128 }
  0x57   : > { %215 = vxpose.xlu0.b32.cont [6/16] %v199_v11, 128 }
  0x5e   : > { %281 = vxpose.xlu1.b32.cont [7/16] %v476_v12, 128 }
  0x5f   : > { %216 = vxpose.xlu0.b32.cont [7/16] %v200_v13, 128 }
  0x66   : > { %282 = vxpose.xlu1.b32.cont [8/16] %v477_v14, 128 }
  0x67   : > { %217 = vxpose.xlu0.b32.cont [8/16] %v201_v15, 128 }
  0x6e   : > { %283 = vxpose.xlu1.b32.cont [9/16] %v478_v16, 128 }
  0x6f   : > { %218 = vxpose.xlu0.b32.cont [9/16] %v202_v17, 128 }
  0x76   : > { %284 = vxpose.xlu1.b32.cont [10/16] %v479_v18, 128 }
  0x77   : > { %219 = vxpose.xlu0.b32.cont [10/16] %v203_v19, 128 }
  0x7e   : > { %285 = vxpose.xlu1.b32.cont [11/16] %v480_v20, 128 }
  0x7f   : > { %220 = vxpose.xlu0.b32.cont [11/16] %v204_v21, 128 }
  0x86   : > { %286 = vxpose.xlu1.b32.cont [12/16] %v481_v22, 128 }
  0x87   : > { %221 = vxpose.xlu0.b32.cont [12/16] %v205_v23, 128 }
  0x8e   : > { %287 = vxpose.xlu1.b32.cont [13/16] %v482_v24, 128 }
  0x8f   : > { %222 = vxpose.xlu0.b32.cont [13/16] %v206_v25, 128 }
  0x96   : > { %288 = vxpose.xlu1.b32.cont [14/16] %v483_v26, 128 }
  0x97   : > { %223 = vxpose.xlu0.b32.cont [14/16] %v207_v27, 128 }
  0x9e   : > { %289 = vxpose.xlu1.b32.cont [15/16] %v484_v28, 128 }
  0x9f   : > { %224 = vxpose.xlu0.b32.cont [15/16] %v208_v29, 128 }
  0xa6   : > { %290 = vxpose.xlu1.b32.end [16/16] %v485_v30, 128 }
  0xa7   : > { %225 = vxpose.xlu0.b32.end [16/16] %v209_v31, 128 }
  0xd2   : > { %v291_v32 = vpop.trf.xlu1 }
  0xd3   : > { %v226_v33 = vpop.trf.xlu0  ;;  %486 = vst [vmem:[%s804_s16 + $0x80] sm:$0xff] %v291_v32 }
  0xd4   : > { %242 = vst [vmem:[%s804_s16] sm:$0xff] %v226_v33 }
  0xda   : > { %v292_v34 = vpop.trf.xlu1 }
  0xdb   : > { %v227_v35 = vpop.trf.xlu0  ;;  %487 = vst [vmem:[%s804_s16 + $0x88] sm:$0xff] %v292_v34 }
  0xdc   : > { %243 = vst [vmem:[%s804_s16 + $0x8] sm:$0xff] %v227_v35 }
  0xe2   : > { %v293_v36 = vpop.trf.xlu1 }
  0xe3   : > { %v228_v37 = vpop.trf.xlu0  ;;  %488 = vst [vmem:[%s804_s16 + $0x90] sm:$0xff] %v293_v36 }
  0xe4   : > { %244 = vst [vmem:[%s804_s16 + $0x10] sm:$0xff] %v228_v37 }
  0xea   : > { %v294_v38 = vpop.trf.xlu1 }
  0xeb   : > { %v229_v39 = vpop.trf.xlu0  ;;  %489 = vst [vmem:[%s804_s16 + $0x98] sm:$0xff] %v294_v38 }
  0xec   : > { %245 = vst [vmem:[%s804_s16 + $0x18] sm:$0xff] %v229_v39 }
  0xf2   : > { %v295_v40 = vpop.trf.xlu1 }
  0xf3   : > { %v230_v41 = vpop.trf.xlu0  ;;  %490 = vst [vmem:[%s804_s16 + $0xa0] sm:$0xff] %v295_v40 }
  0xf4   : > { %246 = vst [vmem:[%s804_s16 + $0x20] sm:$0xff] %v230_v41 }
  0xfa   : > { %v296_v42 = vpop.trf.xlu1 }
  0xfb   : > { %v231_v43 = vpop.trf.xlu0  ;;  %491 = vst [vmem:[%s804_s16 + $0xa8] sm:$0xff] %v296_v42 }
  0xfc   : > { %247 = vst [vmem:[%s804_s16 + $0x28] sm:$0xff] %v231_v43 }
 0x102   : > { %v297_v44 = vpop.trf.xlu1 }
 0x103   : > { %v232_v45 = vpop.trf.xlu0  ;;  %492 = vst [vmem:[%s804_s16 + $0xb0] sm:$0xff] %v297_v44 }
 0x104   : > { %248 = vst [vmem:[%s804_s16 + $0x30] sm:$0xff] %v232_v45 }
 0x10a   : > { %v298_v46 = vpop.trf.xlu1 }
 0x10b   : > { %v233_v47 = vpop.trf.xlu0  ;;  %493 = vst [vmem:[%s804_s16 + $0xb8] sm:$0xff] %v298_v46 }
 0x10c   : > { %249 = vst [vmem:[%s804_s16 + $0x38] sm:$0xff] %v233_v47 }
 0x112   : > { %v299_v48 = vpop.trf.xlu1 }
 0x113   : > { %v234_v49 = vpop.trf.xlu0  ;;  %494 = vst [vmem:[%s804_s16 + $0xc0] sm:$0xff] %v299_v48 }
 0x114   : > { %250 = vst [vmem:[%s804_s16 + $0x40] sm:$0xff] %v234_v49 }
 0x11a   : > { %v300_v50 = vpop.trf.xlu1 }
 0x11b   : > { %v235_v51 = vpop.trf.xlu0  ;;  %495 = vst [vmem:[%s804_s16 + $0xc8] sm:$0xff] %v300_v50 }
 0x11c   : > { %251 = vst [vmem:[%s804_s16 + $0x48] sm:$0xff] %v235_v51 }
 0x122   : > { %v301_v52 = vpop.trf.xlu1 }
 0x123   : > { %v236_v53 = vpop.trf.xlu0  ;;  %496 = vst [vmem:[%s804_s16 + $0xd0] sm:$0xff] %v301_v52 }
 0x124   : > { %252 = vst [vmem:[%s804_s16 + $0x50] sm:$0xff] %v236_v53 }
 0x12a   : > { %v302_v54 = vpop.trf.xlu1 }
 0x12b   : > { %v237_v55 = vpop.trf.xlu0  ;;  %497 = vst [vmem:[%s804_s16 + $0xd8] sm:$0xff] %v302_v54 }
 0x12c   : > { %253 = vst [vmem:[%s804_s16 + $0x58] sm:$0xff] %v237_v55 }
 0x132   : > { %v303_v56 = vpop.trf.xlu1 }
 0x133   : > { %v238_v57 = vpop.trf.xlu0  ;;  %498 = vst [vmem:[%s804_s16 + $0xe0] sm:$0xff] %v303_v56 }
 0x134   : > { %254 = vst [vmem:[%s804_s16 + $0x60] sm:$0xff] %v238_v57 }
 0x13a   : > { %v304_v58 = vpop.trf.xlu1 }
 0x13b   : > { %v239_v59 = vpop.trf.xlu0  ;;  %499 = vst [vmem:[%s804_s16 + $0xe8] sm:$0xff] %v304_v58 }
 0x13c   : > { %255 = vst [vmem:[%s804_s16 + $0x68] sm:$0xff] %v239_v59 }
 0x142   : > { %v305_v60 = vpop.trf.xlu1 }
 0x143   : > { %v240_v61 = vpop.trf.xlu0  ;;  %500 = vst [vmem:[%s804_s16 + $0xf0] sm:$0xff] %v305_v60 }
 0x144   : > { %256 = vst [vmem:[%s804_s16 + $0x70] sm:$0xff] %v240_v61 }
 0x14a   : > { %v306_v62 = vpop.trf.xlu1 }
 0x14b   : > { %v241_v63 = vpop.trf.xlu0  ;;  %501 = vst [vmem:[%s804_s16 + $0xf8] sm:$0xff] %v306_v62 }
 0x14c   : > { %257 = vst [vmem:[%s804_s16 + $0x78] sm:$0xff] %v241_v63 }
 0x14d   : > { %s508_s29 = sshll.u32 %s638_s9, 7  ;;  %s350_s30 = sshll.u32 %s804_s16, 4  ;;  %s351_s30 = int_to_ptr.vmem [resolvable:$true] %s350_s30 }
 0x14e   : > { %s339_s4 = scalar_lea.hbm %s881_s1, %s508_s29  ;;  %s654_s12 = smov 2048  }
 0x14f   : > { %s352_s5 = sshll.u32 %s339_s4, 4  ;;  %518 = sst [smem:[#allocation9]] (%p722_p9), %s654_s12  ;;  %s353_s5 = int_to_ptr.hbm [resolvable:$true] %s352_s5 }
 0x150   : > { %s655_s13 = smov 8192   ;;  %s656_s15 = smov 16  }
 0x151   : > { %519 = sst [smem:[#allocation9 + $0x1]] (%p722_p9), %s655_s13  ;;  %s657_s9 = smov 128  }
 0x152   : > { %520 = sst [smem:[#allocation9 + $0x2]] (%p722_p9), %s656_s15  ;;  %s658_s17 = smov 8  }
 0x153   : > { %521 = sst [smem:[#allocation9 + $0x3]] (%p722_p9), %s657_s9  ;;  %s659_s23 = smov [#allocation8]  }
 0x154   : > { %522 = sst [smem:[#allocation9 + $0x4]] (%p722_p9), %s657_s9  ;;  %s660_s24 = smov 0  }
 0x155   : > { %523 = sst [smem:[#allocation9 + $0x5]] (%p722_p9), %s658_s17 }
 0x156   : > { %524 = dma.general (%p722_p9), %s351_s30, 4096, %s353_s5, %s325_s18, %s659_s23, [#allocation9], %s660_s24, 0  }
 0x157 PF: > { %p530_p2 = scmp.ge.s32.totalorder %s646_s11, 2  ;;  %s380_s25 = sand.u32 1, %s626_s6  }
 0x158   : > { %s381_s26 = scalar_lea.sflag [#allocation4], %s380_s25 }
 0x159   : > { %p527_p3 = pnand %p530_p2, %p729_p11 }
 0x15b   : > { %p528_p4 = pneg %p527_p3 }
 0x15d   : > { %621 = dma.done.wait (%p528_p4), %s381_s26, 4096  }
 0x15e   : > { %623 = vsyncadd (%p528_p4), %s381_s26, 4294963200  ;;  %s17_s11 = sadd.s32 1, %s646_s11   ;;  %s886_s6 = smov %s630_s7 }
 0x15f   : > { %p14_p5 = scmp.ge.s32.totalorder %s17_s11, 6   ;;  %s887_s7 = smov %s634_s8 }
 0x160   : > { %s888_s8 = smov %s727_s20  ;;  %s889_s9 = smov %s642_s10 }
 0x161   : > { %s890_s10 = smov %s892_s14  ;;  %16 = sbr.rel (!%p14_p5) target bundleno = 6 (0x6), region = 81 }
 0x166   :  { %387 = vsyncpa [#allocation3], 1 }
 0x167   :  { %389 = vsyncpa [#allocation3 + $0x1], 1 }
 0x168   :  { %390 = vsyncpa [#allocation4], 1 }
 0x169   :  { %392 = vsyncpa [#allocation4 + $0x1], 1 }

</bundles_post_ra>
